<compile_context>
chip_gen: v7x
topology: tpu7x:2x2x1
jax: 0.10.0
libtpu: 0.0.40
codegen_flags: <defaults>
</compile_context>

<pallas_src>
import functools

import jax
import jax.numpy as jnp
from jax import lax
from jax.experimental import pallas as pl
from jax.experimental.pallas import tpu as pltpu

BN_EPS = 1e-5

D_IN = 784
H1, H2, H3, D_OUT = 150, 100, 50, 10
H1P, H2P, H3P, D_OUTP = 256, 128, 128, 128   # lane-padded (multiples of 128)

MAX_BTILE = 2048                 # x tile f32 = 6.3 MiB; fine with vmem_limit below
MAX_H2_STAGE_BYTES = 16 * 1024 * 1024   # VMEM budget for the staged-h2 slab


def _round_up(n, m):
    return ((n + m - 1) // m) * m


def mlp_kernel(x_ref, w1_ref, b1_ref, w2_ref, b2_ref, gamma_ref, beta_ref,
               w3_ref, b3_ref, w4_ref, b4_ref, o_ref, h2_sc, sum_sc, ssq_sc,
               *, inv_n, n_valid, mask_pad):
    phase = pl.program_id(0)   # 0: fc1/fc2 + BN stats + stage h2, 1: BN + fc3/fc4
    bt = pl.program_id(1)      # batch tile index
    btile = x_ref.shape[0]

    @pl.when(phase == 0)
    def _():
        @pl.when(bt == 0)
        def _():
            sum_sc[...] = jnp.zeros_like(sum_sc)
            ssq_sc[...] = jnp.zeros_like(ssq_sc)

        # fc1 + relu, fc2 — executed once per row (bf16 MXU, f32 accumulate).
        x = x_ref[...].astype(jnp.bfloat16)                             # (Bt, 784)
        h1 = jnp.dot(x, w1_ref[...], preferred_element_type=jnp.float32) + b1_ref[...]
        h1 = jnp.maximum(h1, 0.0)
        h2 = jnp.dot(h1.astype(jnp.bfloat16), w2_ref[...],
                     preferred_element_type=jnp.float32) + b2_ref[...]  # f32 (Bt, 128)

        if mask_pad:
            # Zero-padded batch rows must not pollute the BatchNorm statistics.
            rows = bt * btile + lax.broadcasted_iota(jnp.int32, (btile, 1), 0)
            valid = (rows < n_valid).astype(jnp.float32)
            h2s = h2 * valid
        else:
            h2s = h2
        sum_sc[...] = sum_sc[...] + jnp.sum(h2s, axis=0, keepdims=True)
        ssq_sc[...] = ssq_sc[...] + jnp.sum(h2s * h2, axis=0, keepdims=True)

        # Stage h2 for phase 1 (bf16: fc3 consumes bf16 inputs anyway).
        h2_sc[bt] = h2.astype(jnp.bfloat16)

    @pl.when(phase == 1)
    def _():
        # Training-mode BatchNorm1d(100): batch mean, biased batch variance (f32).
        mean = sum_sc[...] * inv_n
        var = jnp.maximum(ssq_sc[...] * inv_n - mean * mean, 0.0)

        h2 = h2_sc[bt].astype(jnp.float32)
        h2n = (h2 - mean) * lax.rsqrt(var + BN_EPS) * gamma_ref[...] + beta_ref[...]
        h2n = jnp.maximum(h2n, 0.0)   # padded cols stay exactly 0 (gamma/beta padded w/ 0)

        h3 = jnp.dot(h2n.astype(jnp.bfloat16), w3_ref[...],
                     preferred_element_type=jnp.float32) + b3_ref[...]
        h3 = jnp.maximum(h3, 0.0)

        out = jnp.dot(h3.astype(jnp.bfloat16), w4_ref[...],
                      preferred_element_type=jnp.float32) + b4_ref[...]
        o_ref[...] = out.astype(o_ref.dtype)
    # o_ref untouched in phase 0; with the phase-aware out index_map its block
    # index stays pinned during phase 0, so no garbage writeback ever reaches HBM.


def mlp_forward(x, kparams):
    x = x.reshape(-1, D_IN).astype(jnp.float32)
    B = x.shape[0]

    # Tile selection: minimal padding, sublane-aligned tile, large enough to
    # amortize the ~0.35 us per-grid-step overhead.
    nbt = -(-B // MAX_BTILE)                 # ceil(B / MAX_BTILE)
    btile = _round_up(-(-B // nbt), 8)       # per-tile rows, multiple of 8
    b_pad = nbt * btile
    if b_pad != B:
        x = jnp.pad(x, ((0, b_pad - B), (0, 0)))

    stage_bytes = b_pad * H2P * 2
    assert stage_bytes <= MAX_H2_STAGE_BYTES, (
        f"staged h2 ({stage_bytes} B) exceeds VMEM budget; need HBM staging path")

    const = lambda p, b: (0, 0)          # weights/biases: VMEM-resident across the grid
    x_map = lambda p, b: ((1 - p) * b, 0)  # tiled in phase 0, pinned in phase 1 (no re-DMA)
    o_map = lambda p, b: (p * b, 0)        # pinned in phase 0 (no garbage writeback)

    (w1, b1, w2, b2, gamma, beta, w3, b3, w4, b4) = kparams

    flops = 2 * b_pad * (D_IN * H1P + H1P * H2P + H2P * H3P + H3P * D_OUTP)
    bytes_w = 2 * (D_IN * H1P + H1P * H2P + H2P * H3P + H3P * D_OUTP)   # bf16 weights
    bytes_accessed = b_pad * D_IN * 4 + b_pad * D_OUTP * 4 + bytes_w    # x read once

    out = pl.pallas_call(
        functools.partial(mlp_kernel, inv_n=1.0 / B, n_valid=B,
                          mask_pad=(b_pad != B)),
        out_shape=jax.ShapeDtypeStruct((b_pad, D_OUTP), jnp.float32),
        grid_spec=pltpu.PrefetchScalarGridSpec(
            num_scalar_prefetch=0,
            grid=(2, nbt),                            # (phase, batch-tile)
            in_specs=[
                pl.BlockSpec((btile, D_IN), x_map),   # x (f32, cast in-kernel)
                pl.BlockSpec((D_IN, H1P), const),     # w1
                pl.BlockSpec((1, H1P), const),        # b1
                pl.BlockSpec((H1P, H2P), const),      # w2
                pl.BlockSpec((1, H2P), const),        # b2
                pl.BlockSpec((1, H2P), const),        # gamma (zero-padded)
                pl.BlockSpec((1, H2P), const),        # beta  (zero-padded)
                pl.BlockSpec((H2P, H3P), const),      # w3
                pl.BlockSpec((1, H3P), const),        # b3
                pl.BlockSpec((H3P, D_OUTP), const),   # w4
                pl.BlockSpec((1, D_OUTP), const),     # b4
            ],
            out_specs=pl.BlockSpec((btile, D_OUTP), o_map),
            scratch_shapes=[pltpu.VMEM((nbt, btile, H2P), jnp.bfloat16),  # staged h2
                            pltpu.VMEM((1, H2P), jnp.float32),            # sum(h2)
                            pltpu.VMEM((1, H2P), jnp.float32)],           # sum(h2^2)
        ),
        compiler_params=pltpu.CompilerParams(
            # phase axis is sequential; batch axis shares BN-stat / h2 scratch,
            # so it must also stay "arbitrary" (no megacore sharding).
            dimension_semantics=("arbitrary", "arbitrary"),
            vmem_limit_bytes=48 * 1024 * 1024),
        cost_estimate=pl.CostEstimate(flops=flops, transcendentals=H2P,
                                      bytes_accessed=bytes_accessed),
    )(x, w1, b1, w2, b2, gamma, beta, w3, b3, w4, b4)
    return out[:B, :D_OUT]


def init_params(key):
    """Deterministic PyTorch-style init. Linear weights stored as (in, out), f32."""
    def linear(key, fan_in, fan_out):
        kw, kb = jax.random.split(key)
        bound = 1.0 / jnp.sqrt(fan_in)
        w = jax.random.uniform(kw, (fan_in, fan_out), jnp.float32, -bound, bound)
        b = jax.random.uniform(kb, (1, fan_out), jnp.float32, -bound, bound)
        return w, b

    k1, k2, k3, k4 = jax.random.split(key, 4)
    w1, b1 = linear(k1, D_IN, H1)
    w2, b2 = linear(k2, H1, H2)
    w3, b3 = linear(k3, H2, H3)
    w4, b4 = linear(k4, H3, D_OUT)
    gamma = jnp.ones((1, H2), jnp.float32)   # BatchNorm1d(100) weight
    beta = jnp.zeros((1, H2), jnp.float32)   # BatchNorm1d(100) bias
    return (w1, b1, w2, b2, gamma, beta, w3, b3, w4, b4)


def pad_and_cast_params(params):
    """Zero-pad feature dims to lane multiples; weights -> bf16, vectors -> f32."""
    (w1, b1, w2, b2, gamma, beta, w3, b3, w4, b4) = params

    def padw(w, rows, cols):
        w = jnp.pad(w, ((0, rows - w.shape[0]), (0, cols - w.shape[1])))
        return w.astype(jnp.bfloat16)

    def padv(v, cols):
        return jnp.pad(v, ((0, 0), (0, cols - v.shape[1]))).astype(jnp.float32)

    return (
        padw(w1, D_IN, H1P), padv(b1, H1P),
        padw(w2, H1P, H2P), padv(b2, H2P),
        padv(gamma, H2P), padv(beta, H2P),      # zero padding keeps padded BN cols at 0
        padw(w3, H2P, H3P), padv(b3, H3P),
        padw(w4, H3P, D_OUTP), padv(b4, D_OUTP),
    )


def mlp_reference(x, params):
    """Pure-JAX f32 reference with training-mode BatchNorm (batch stats, biased var)."""
    (w1, b1, w2, b2, gamma, beta, w3, b3, w4, b4) = params
    x = x.reshape(-1, D_IN)
    h1 = jnp.maximum(x @ w1 + b1, 0.0)
    h2 = h1 @ w2 + b2
    mean = jnp.mean(h2, axis=0, keepdims=True)
    var = jnp.mean((h2 - mean) ** 2, axis=0, keepdims=True)
    h2n = jnp.maximum((h2 - mean) * lax.rsqrt(var + BN_EPS) * gamma + beta, 0.0)
    h3 = jnp.maximum(h2n @ w3 + b3, 0.0)
    return h3 @ w4 + b4


if __name__ == "__main__":
    key = jax.random.PRNGKey(0)
    kx, kp = jax.random.split(key)

    B = 8  # small demo batch (>= 2 required for training-mode BatchNorm)
    x = jax.random.normal(kx, (B, D_IN), jnp.float32)

    params = init_params(kp)
    kparams = pad_and_cast_params(params)

    out = mlp_forward(x, kparams)
    out = jax.block_until_ready(out)
    assert out.shape == (B, D_OUT) and out.dtype == jnp.float32

    ref = mlp_reference(x, params)
    max_err = float(jnp.max(jnp.abs(out - ref)))
    assert max_err < 1e-1, f"kernel/reference mismatch: max abs err {max_err}"

    print("KERNEL_OK")
</pallas_src>

<mosaic_0001>
module attributes {stable_mosaic.version = 11 : i64} {
  func.func @mlp_kernel(%arg0: i32, %arg1: i32, %arg2: memref<8x784xf32, #tpu.memory_space<vmem>>, %arg3: memref<784x256xbf16, #tpu.memory_space<vmem>>, %arg4: memref<1x256xf32, #tpu.memory_space<vmem>>, %arg5: memref<256x128xbf16, #tpu.memory_space<vmem>>, %arg6: memref<1x128xf32, #tpu.memory_space<vmem>>, %arg7: memref<1x128xf32, #tpu.memory_space<vmem>>, %arg8: memref<1x128xf32, #tpu.memory_space<vmem>>, %arg9: memref<128x128xbf16, #tpu.memory_space<vmem>>, %arg10: memref<1x128xf32, #tpu.memory_space<vmem>>, %arg11: memref<128x128xbf16, #tpu.memory_space<vmem>>, %arg12: memref<1x128xf32, #tpu.memory_space<vmem>>, %arg13: memref<8x128xf32, #tpu.memory_space<vmem>>, %arg14: memref<1x8x128xbf16, #tpu.memory_space<vmem>>, %arg15: memref<1x128xf32, #tpu.memory_space<vmem>>, %arg16: memref<1x128xf32, #tpu.memory_space<vmem>>) attributes {dimension_semantics = [#tpu.dimension_semantics<arbitrary>, #tpu.dimension_semantics<arbitrary>], iteration_bounds = array<i64: 2, 1>, scalar_prefetch = 0 : i64, scratch_operands = 3 : i64, tpu.core_type = #tpu.core_type<tc>, window_params = [{transform_indices = @transform_0, window_bounds = array<i64: 8, 784>}, {pipeline_mode = #tpu.pipeline_mode<synchronous>, transform_indices = @transform_1, window_bounds = array<i64: 784, 256>}, {pipeline_mode = #tpu.pipeline_mode<synchronous>, transform_indices = @transform_2, window_bounds = array<i64: 1, 256>}, {pipeline_mode = #tpu.pipeline_mode<synchronous>, transform_indices = @transform_3, window_bounds = array<i64: 256, 128>}, {pipeline_mode = #tpu.pipeline_mode<synchronous>, transform_indices = @transform_4, window_bounds = array<i64: 1, 128>}, {pipeline_mode = #tpu.pipeline_mode<synchronous>, transform_indices = @transform_5, window_bounds = array<i64: 1, 128>}, {pipeline_mode = #tpu.pipeline_mode<synchronous>, transform_indices = @transform_6, window_bounds = array<i64: 1, 128>}, {pipeline_mode = #tpu.pipeline_mode<synchronous>, transform_indices = @transform_7, window_bounds = array<i64: 128, 128>}, {pipeline_mode = #tpu.pipeline_mode<synchronous>, transform_indices = @transform_8, window_bounds = array<i64: 1, 128>}, {pipeline_mode = #tpu.pipeline_mode<synchronous>, transform_indices = @transform_9, window_bounds = array<i64: 128, 128>}, {pipeline_mode = #tpu.pipeline_mode<synchronous>, transform_indices = @transform_10, window_bounds = array<i64: 1, 128>}, {transform_indices = @transform_11, window_bounds = array<i64: 8, 128>}]} {
    %c0_i32 = arith.constant 0 : i32
    %0 = arith.cmpi eq, %arg0, %c0_i32 : i32
    %1 = arith.extui %0 : i1 to i32
    %c0_i32_0 = arith.constant 0 : i32
    %2 = arith.cmpi ne, %1, %c0_i32_0 : i32
    scf.if %2 {
      %c0_i32_2 = arith.constant 0 : i32
      %6 = arith.cmpi eq, %arg1, %c0_i32_2 : i32
      %7 = arith.extui %6 : i1 to i32
      %c0_i32_3 = arith.constant 0 : i32
      %8 = arith.cmpi ne, %7, %c0_i32_3 : i32
      scf.if %8 {
        %cst_27 = arith.constant 0.000000e+00 : f32
        %40 = vector.broadcast %cst_27 : f32 to vector<1x128xf32>
        %c0_28 = arith.constant 0 : index
        %c0_29 = arith.constant 0 : index
        %41 = vector.load %arg15[%c0_28, %c0_29] : memref<1x128xf32, #tpu.memory_space<vmem>>, vector<1x128xf32>
        tpu.vector_store %arg15[%c0_28, %c0_29], %40 {strides = array<i32>} : memref<1x128xf32, #tpu.memory_space<vmem>>, vector<1x128xf32>,
        %cst_30 = arith.constant 0.000000e+00 : f32
        %42 = vector.broadcast %cst_30 : f32 to vector<1x128xf32>
        %c0_31 = arith.constant 0 : index
        %c0_32 = arith.constant 0 : index
        %43 = vector.load %arg16[%c0_31, %c0_32] : memref<1x128xf32, #tpu.memory_space<vmem>>, vector<1x128xf32>
        tpu.vector_store %arg16[%c0_31, %c0_32], %42 {strides = array<i32>} : memref<1x128xf32, #tpu.memory_space<vmem>>, vector<1x128xf32>,
      } else {
      }
      %c0 = arith.constant 0 : index
      %c0_4 = arith.constant 0 : index
      %9 = vector.load %arg2[%c0, %c0_4] : memref<8x784xf32, #tpu.memory_space<vmem>>, vector<8x784xf32>
      %10 = arith.truncf %9 : vector<8x784xf32> to vector<8x784xbf16>
      %c0_5 = arith.constant 0 : index
      %c0_6 = arith.constant 0 : index
      %11 = vector.load %arg3[%c0_5, %c0_6] : memref<784x256xbf16, #tpu.memory_space<vmem>>, vector<784x256xbf16>
      %cst = arith.constant dense<0.000000e+00> : vector<8x256xf32>
      %12 = tpu.matmul %10, %11, %cst {dimension_numbers = #tpu.dot_dimension_numbers<[1], [0], [0], [1], [0, 0, 1, 1], [], []>} : vector<8x784xbf16>, vector<784x256xbf16>, vector<8x256xf32> -> vector<8x256xf32>
      %c0_7 = arith.constant 0 : index
      %c0_8 = arith.constant 0 : index
      %13 = vector.load %arg4[%c0_7, %c0_8] : memref<1x256xf32, #tpu.memory_space<vmem>>, vector<1x256xf32>
      %14 = vector.broadcast %13 : vector<1x256xf32> to vector<8x256xf32>
      %15 = arith.addf %12, %14 : vector<8x256xf32>
      %cst_9 = arith.constant 0.000000e+00 : f32
      %16 = vector.broadcast %cst_9 : f32 to vector<8x256xf32>
      %17 = arith.maximumf %15, %16 : vector<8x256xf32>
      %18 = arith.truncf %17 : vector<8x256xf32> to vector<8x256xbf16>
      %c0_10 = arith.constant 0 : index
      %c0_11 = arith.constant 0 : index
      %19 = vector.load %arg5[%c0_10, %c0_11] : memref<256x128xbf16, #tpu.memory_space<vmem>>, vector<256x128xbf16>
      %cst_12 = arith.constant dense<0.000000e+00> : vector<8x128xf32>
      %20 = tpu.matmul %18, %19, %cst_12 {dimension_numbers = #tpu.dot_dimension_numbers<[1], [0], [0], [1], [0, 0, 1, 1], [], []>} : vector<8x256xbf16>, vector<256x128xbf16>, vector<8x128xf32> -> vector<8x128xf32>
      %c0_13 = arith.constant 0 : index
      %c0_14 = arith.constant 0 : index
      %21 = vector.load %arg6[%c0_13, %c0_14] : memref<1x128xf32, #tpu.memory_space<vmem>>, vector<1x128xf32>
      %22 = vector.broadcast %21 : vector<1x128xf32> to vector<8x128xf32>
      %23 = arith.addf %20, %22 : vector<8x128xf32>
      %c0_15 = arith.constant 0 : index
      %c0_16 = arith.constant 0 : index
      %24 = vector.load %arg15[%c0_15, %c0_16] : memref<1x128xf32, #tpu.memory_space<vmem>>, vector<1x128xf32>
      %cst_17 = arith.constant dense<0.000000e+00> : vector<128xf32>
      %25 = vector.multi_reduction <add>, %23, %cst_17 [0] : vector<8x128xf32> to vector<128xf32>
      %26 = vector.shape_cast %25 : vector<128xf32> to vector<1x128xf32>
      %27 = arith.addf %24, %26 : vector<1x128xf32>
      %c0_18 = arith.constant 0 : index
      %c0_19 = arith.constant 0 : index
      %28 = vector.load %arg15[%c0_18, %c0_19] : memref<1x128xf32, #tpu.memory_space<vmem>>, vector<1x128xf32>
      tpu.vector_store %arg15[%c0_18, %c0_19], %27 {strides = array<i32>} : memref<1x128xf32, #tpu.memory_space<vmem>>, vector<1x128xf32>,
      %c0_20 = arith.constant 0 : index
      %c0_21 = arith.constant 0 : index
      %29 = vector.load %arg16[%c0_20, %c0_21] : memref<1x128xf32, #tpu.memory_space<vmem>>, vector<1x128xf32>
      %30 = arith.mulf %23, %23 : vector<8x128xf32>
      %cst_22 = arith.constant dense<0.000000e+00> : vector<128xf32>
      %31 = vector.multi_reduction <add>, %30, %cst_22 [0] : vector<8x128xf32> to vector<128xf32>
      %32 = vector.shape_cast %31 : vector<128xf32> to vector<1x128xf32>
      %33 = arith.addf %29, %32 : vector<1x128xf32>
      %c0_23 = arith.constant 0 : index
      %c0_24 = arith.constant 0 : index
      %34 = vector.load %arg16[%c0_23, %c0_24] : memref<1x128xf32, #tpu.memory_space<vmem>>, vector<1x128xf32>
      tpu.vector_store %arg16[%c0_23, %c0_24], %33 {strides = array<i32>} : memref<1x128xf32, #tpu.memory_space<vmem>>, vector<1x128xf32>,
      %35 = arith.truncf %23 : vector<8x128xf32> to vector<8x128xbf16>
      %36 = arith.index_cast %arg1 : i32 to index
      %c0_25 = arith.constant 0 : index
      %c0_26 = arith.constant 0 : index
      %37 = vector.load %arg14[%36, %c0_25, %c0_26] : memref<1x8x128xbf16, #tpu.memory_space<vmem>>, vector<1x8x128xbf16>
      %38 = vector.shape_cast %37 : vector<1x8x128xbf16> to vector<8x128xbf16>
      %39 = vector.shape_cast %35 : vector<8x128xbf16> to vector<1x8x128xbf16>
      tpu.vector_store %arg14[%36, %c0_25, %c0_26], %39 {strides = array<i32>} : memref<1x8x128xbf16, #tpu.memory_space<vmem>>, vector<1x8x128xbf16>,
    } else {
    }
    %c1_i32 = arith.constant 1 : i32
    %3 = arith.cmpi eq, %arg0, %c1_i32 : i32
    %4 = arith.extui %3 : i1 to i32
    %c0_i32_1 = arith.constant 0 : i32
    %5 = arith.cmpi ne, %4, %c0_i32_1 : i32
    scf.if %5 {
      %c0 = arith.constant 0 : index
      %c0_2 = arith.constant 0 : index
      %6 = vector.load %arg15[%c0, %c0_2] : memref<1x128xf32, #tpu.memory_space<vmem>>, vector<1x128xf32>
      %cst = arith.constant 1.250000e-01 : f32
      %7 = vector.broadcast %cst : f32 to vector<1x128xf32>
      %8 = arith.mulf %6, %7 : vector<1x128xf32>
      %c0_3 = arith.constant 0 : index
      %c0_4 = arith.constant 0 : index
      %9 = vector.load %arg16[%c0_3, %c0_4] : memref<1x128xf32, #tpu.memory_space<vmem>>, vector<1x128xf32>
      %cst_5 = arith.constant 1.250000e-01 : f32
      %10 = vector.broadcast %cst_5 : f32 to vector<1x128xf32>
      %11 = arith.mulf %9, %10 : vector<1x128xf32>
      %12 = arith.mulf %8, %8 : vector<1x128xf32>
      %13 = arith.subf %11, %12 : vector<1x128xf32>
      %cst_6 = arith.constant 0.000000e+00 : f32
      %14 = vector.broadcast %cst_6 : f32 to vector<1x128xf32>
      %15 = arith.maximumf %13, %14 : vector<1x128xf32>
      %16 = arith.index_cast %arg1 : i32 to index
      %c0_7 = arith.constant 0 : index
      %c0_8 = arith.constant 0 : index
      %17 = vector.load %arg14[%16, %c0_7, %c0_8] : memref<1x8x128xbf16, #tpu.memory_space<vmem>>, vector<1x8x128xbf16>
      %18 = vector.shape_cast %17 : vector<1x8x128xbf16> to vector<8x128xbf16>
      %19 = arith.extf %18 : vector<8x128xbf16> to vector<8x128xf32>
      %20 = vector.broadcast %8 : vector<1x128xf32> to vector<8x128xf32>
      %21 = arith.subf %19, %20 : vector<8x128xf32>
      %cst_9 = arith.constant 9.99999974E-6 : f32
      %22 = vector.broadcast %cst_9 : f32 to vector<1x128xf32>
      %23 = arith.addf %15, %22 : vector<1x128xf32>
      %24 = math.rsqrt %23 : vector<1x128xf32>
      %25 = vector.broadcast %24 : vector<1x128xf32> to vector<8x128xf32>
      %26 = arith.mulf %21, %25 : vector<8x128xf32>
      %c0_10 = arith.constant 0 : index
      %c0_11 = arith.constant 0 : index
      %27 = vector.load %arg7[%c0_10, %c0_11] : memref<1x128xf32, #tpu.memory_space<vmem>>, vector<1x128xf32>
      %28 = vector.broadcast %27 : vector<1x128xf32> to vector<8x128xf32>
      %29 = arith.mulf %26, %28 : vector<8x128xf32>
      %c0_12 = arith.constant 0 : index
      %c0_13 = arith.constant 0 : index
      %30 = vector.load %arg8[%c0_12, %c0_13] : memref<1x128xf32, #tpu.memory_space<vmem>>, vector<1x128xf32>
      %31 = vector.broadcast %30 : vector<1x128xf32> to vector<8x128xf32>
      %32 = arith.addf %29, %31 : vector<8x128xf32>
      %cst_14 = arith.constant 0.000000e+00 : f32
      %33 = vector.broadcast %cst_14 : f32 to vector<8x128xf32>
      %34 = arith.maximumf %32, %33 : vector<8x128xf32>
      %35 = arith.truncf %34 : vector<8x128xf32> to vector<8x128xbf16>
      %c0_15 = arith.constant 0 : index
      %c0_16 = arith.constant 0 : index
      %36 = vector.load %arg9[%c0_15, %c0_16] : memref<128x128xbf16, #tpu.memory_space<vmem>>, vector<128x128xbf16>
      %cst_17 = arith.constant dense<0.000000e+00> : vector<8x128xf32>
      %37 = tpu.matmul %35, %36, %cst_17 {dimension_numbers = #tpu.dot_dimension_numbers<[1], [0], [0], [1], [0, 0, 1, 1], [], []>} : vector<8x128xbf16>, vector<128x128xbf16>, vector<8x128xf32> -> vector<8x128xf32>
      %c0_18 = arith.constant 0 : index
      %c0_19 = arith.constant 0 : index
      %38 = vector.load %arg10[%c0_18, %c0_19] : memref<1x128xf32, #tpu.memory_space<vmem>>, vector<1x128xf32>
      %39 = vector.broadcast %38 : vector<1x128xf32> to vector<8x128xf32>
      %40 = arith.addf %37, %39 : vector<8x128xf32>
      %cst_20 = arith.constant 0.000000e+00 : f32
      %41 = vector.broadcast %cst_20 : f32 to vector<8x128xf32>
      %42 = arith.maximumf %40, %41 : vector<8x128xf32>
      %43 = arith.truncf %42 : vector<8x128xf32> to vector<8x128xbf16>
      %c0_21 = arith.constant 0 : index
      %c0_22 = arith.constant 0 : index
      %44 = vector.load %arg11[%c0_21, %c0_22] : memref<128x128xbf16, #tpu.memory_space<vmem>>, vector<128x128xbf16>
      %cst_23 = arith.constant dense<0.000000e+00> : vector<8x128xf32>
      %45 = tpu.matmul %43, %44, %cst_23 {dimension_numbers = #tpu.dot_dimension_numbers<[1], [0], [0], [1], [0, 0, 1, 1], [], []>} : vector<8x128xbf16>, vector<128x128xbf16>, vector<8x128xf32> -> vector<8x128xf32>
      %c0_24 = arith.constant 0 : index
      %c0_25 = arith.constant 0 : index
      %46 = vector.load %arg12[%c0_24, %c0_25] : memref<1x128xf32, #tpu.memory_space<vmem>>, vector<1x128xf32>
      %47 = vector.broadcast %46 : vector<1x128xf32> to vector<8x128xf32>
      %48 = arith.addf %45, %47 : vector<8x128xf32>
      %c0_26 = arith.constant 0 : index
      %c0_27 = arith.constant 0 : index
      %49 = vector.load %arg13[%c0_26, %c0_27] : memref<8x128xf32, #tpu.memory_space<vmem>>, vector<8x128xf32>
      tpu.vector_store %arg13[%c0_26, %c0_27], %48 {strides = array<i32>} : memref<8x128xf32, #tpu.memory_space<vmem>>, vector<8x128xf32>,
    } else {
    }
    return
  }
  func.func @transform_0(%arg0: i32, %arg1: i32) -> (i32, i32) {
    %c1_i32 = arith.constant 1 : i32
    %0 = arith.subi %c1_i32, %arg0 : i32
    %1 = arith.muli %0, %arg1 : i32
    %c0_i32 = arith.constant 0 : i32
    %c0_i32_0 = arith.constant 0 : i32
    return %1, %c0_i32 : i32, i32
  }
  func.func @transform_1(%arg0: i32, %arg1: i32) -> (i32, i32) {
    %c0_i32 = arith.constant 0 : i32
    %c0_i32_0 = arith.constant 0 : i32
    %c0_i32_1 = arith.constant 0 : i32
    return %c0_i32, %c0_i32_0 : i32, i32
  }
  func.func @transform_2(%arg0: i32, %arg1: i32) -> (i32, i32) {
    %c0_i32 = arith.constant 0 : i32
    %c0_i32_0 = arith.constant 0 : i32
    %c0_i32_1 = arith.constant 0 : i32
    return %c0_i32, %c0_i32_0 : i32, i32
  }
  func.func @transform_3(%arg0: i32, %arg1: i32) -> (i32, i32) {
    %c0_i32 = arith.constant 0 : i32
    %c0_i32_0 = arith.constant 0 : i32
    %c0_i32_1 = arith.constant 0 : i32
    return %c0_i32, %c0_i32_0 : i32, i32
  }
  func.func @transform_4(%arg0: i32, %arg1: i32) -> (i32, i32) {
    %c0_i32 = arith.constant 0 : i32
    %c0_i32_0 = arith.constant 0 : i32
    %c0_i32_1 = arith.constant 0 : i32
    return %c0_i32, %c0_i32_0 : i32, i32
  }
  func.func @transform_5(%arg0: i32, %arg1: i32) -> (i32, i32) {
    %c0_i32 = arith.constant 0 : i32
    %c0_i32_0 = arith.constant 0 : i32
    %c0_i32_1 = arith.constant 0 : i32
    return %c0_i32, %c0_i32_0 : i32, i32
  }
  func.func @transform_6(%arg0: i32, %arg1: i32) -> (i32, i32) {
    %c0_i32 = arith.constant 0 : i32
    %c0_i32_0 = arith.constant 0 : i32
    %c0_i32_1 = arith.constant 0 : i32
    return %c0_i32, %c0_i32_0 : i32, i32
  }
  func.func @transform_7(%arg0: i32, %arg1: i32) -> (i32, i32) {
    %c0_i32 = arith.constant 0 : i32
    %c0_i32_0 = arith.constant 0 : i32
    %c0_i32_1 = arith.constant 0 : i32
    return %c0_i32, %c0_i32_0 : i32, i32
  }
  func.func @transform_8(%arg0: i32, %arg1: i32) -> (i32, i32) {
    %c0_i32 = arith.constant 0 : i32
    %c0_i32_0 = arith.constant 0 : i32
    %c0_i32_1 = arith.constant 0 : i32
    return %c0_i32, %c0_i32_0 : i32, i32
  }
  func.func @transform_9(%arg0: i32, %arg1: i32) -> (i32, i32) {
    %c0_i32 = arith.constant 0 : i32
    %c0_i32_0 = arith.constant 0 : i32
    %c0_i32_1 = arith.constant 0 : i32
    return %c0_i32, %c0_i32_0 : i32, i32
  }
  func.func @transform_10(%arg0: i32, %arg1: i32) -> (i32, i32) {
    %c0_i32 = arith.constant 0 : i32
    %c0_i32_0 = arith.constant 0 : i32
    %c0_i32_1 = arith.constant 0 : i32
    return %c0_i32, %c0_i32_0 : i32, i32
  }
  func.func @transform_11(%arg0: i32, %arg1: i32) -> (i32, i32) {
    %0 = arith.muli %arg0, %arg1 : i32
    %c0_i32 = arith.constant 0 : i32
    %c0_i32_0 = arith.constant 0 : i32
    return %0, %c0_i32 : i32, i32
  }
}

</mosaic_0001>

<bundles_post_ra>
// kernel: tpu_custom_call.1
= control target key start
LH: loop header
LB: loop body
LE: loop exit
PB: predicated region body
PF: predicated region fallthrough
CT: control target
= control target key end

     0   :  { %s2936_s0 = inlined_call_operand.hbm [shape: f32[8,784], index: 0, kind: input, shape index: {}]   ;;  %s2937_s1 = inlined_call_operand.hbm [shape: bf16[784,256], index: 1, kind: input, shape index: {}]   ;;  %s2938_s2 = inlined_call_operand.vmem [shape: f32[1,256], index: 2, kind: input, shape index: {}]   ;;  %s2939_s3 = inlined_call_operand.hbm [shape: bf16[256,128], index: 3, kind: input, shape index: {}]   ;;  %s2940_s4 = inlined_call_operand.vmem [shape: f32[1,128], index: 4, kind: input, shape index: {}]   ;;  %s2941_s5 = inlined_call_operand.vmem [shape: f32[1,128], index: 5, kind: input, shape index: {}]   ;;  %s2942_s6 = inlined_call_operand.vmem [shape: f32[1,128], index: 6, kind: input, shape index: {}]   ;;  %s2943_s7 = inlined_call_operand.hbm [shape: bf16[128,128], index: 7, kind: input, shape index: {}]   ;;  %s2944_s8 = inlined_call_operand.vmem [shape: f32[1,128], index: 8, kind: input, shape index: {}]   ;;  %s2945_s9 = inlined_call_operand.hbm [shape: bf16[128,128], index: 9, kind: input, shape index: {}]   ;;  %s2946_s10 = inlined_call_operand.vmem [shape: f32[1,128], index: 10, kind: input, shape index: {}]   ;;  %s2947_s11 = inlined_call_operand.hbm [shape: f32[8,128], index: 11, kind: output, shape index: {}]  }
   0x1   :  { %2954 = sst [smem:[#allocation21_spill]] %s2944_s8 }
   0x2   :  { %2955 = sst [smem:[#allocation22_spill]] %s2946_s10 }
   0x3   :  { %2956 = sst [smem:[#allocation23_spill]] %s2947_s11 }
   0x4   :  { %16 = vsyncpa [#allocation6], 0 }
   0x5   :  { %18 = vsyncpa [#allocation6 + $0x1], 0 }
   0x6   :  { %19 = vsyncpa [#allocation9], 0 }
   0x7   :  { %20 = vsyncpa [#allocation12], 0 }
   0x8   :  { %21 = vsyncpa [#allocation7], 0 }
   0x9   :  { %23 = vsyncpa [#allocation7 + $0x1], 0  ;;  %s2693_s17 = smov 0   ;;  %s2695_s18 = smov 0  }
   0xa   :  { %s2697_s19 = smov 0  }
   0xb LB: > { %2957 = sst [smem:[#allocation19_spill]] %s2613_s18  ;;  %s2951_s20 = sadd.s32 4294967295, %s2617_s19   ;;  %s2617_s19 = sphi %s2697_s19, %s29_s19   ;;  %s2613_s18 = sphi %s2695_s18, %s2976_s18   ;;  %s2609_s17 = sphi %s2693_s17, %s2975_s17  }
   0xc   : > { %s41_s22 = sadd.s32 1, %s2613_s18  ;;  %p1890_p0 = scmp.ge.s32.totalorder %s2617_s19, 1 }
   0xd   : > { %p43_p1 = scmp.ge.s32.totalorder %s41_s22, 2  ;;  %p314_p2 = scmp.lt.s32.totalorder %s2617_s19, 3 }
   0xe   : > { %p2715_p3 = scmp.eq.s32.totalorder %s2951_s20, 0  ;;  %s2619_s25 = smov [#allocation8]  }
   0xf   : > { %s2978_s22 = smov (%p43_p1, %s41_s22), 0  ;;  %p2721_p4 = pnand %p1890_p0, %p314_p2 }
  0x10   : > { %s2958_s23 = scalar_select %p2715_p3, 1, 0 }
  0x11   : > { %2959 = sst [smem:[#allocation20_spill]] %s2978_s22  ;;  %s326_s26 = sshll.u32 %s2619_s25, 4  ;;  %s327_s26 = int_to_ptr.vmem [resolvable:$true] %s326_s26 }
  0x12   : > { %s2960_s24 = scalar_select %p2721_p4, 1, 0 }
  0x13   : > { %p2159_p5 = pneg %p2721_p4  ;;  %s2413_s30 = scalar_lea.hbm %s2937_s1, 12544 }
  0x14   : > { %p2414_p8 = scmp.ne.s32.totalorder %s2937_s1, %s2413_s30  ;;  %p2420_p12 = scmp.lt.u32.totalorder %s2413_s30, %s2937_s1 }
  0x15   : > { %p2730_p7 = pnand %p2715_p3, %p2159_p5 }
  0x17   : > { %p2742_p9 = pneg %p2730_p7 }
  0x19   : > { %p2416_p10 = pnand %p2742_p9, %p2414_p8 }
  0x1b   : > { %p2417_p11 = pneg %p2416_p10 }
  0x1d   : > { %p2422_p13 = pnand %p2420_p12, %p2417_p11 }
  0x1f   : > { %2425 = shalt.err (!%p2422_p13)
}
  0x20   : > { %s2426_s25 = scalar_lea.vmem %s327_s26, 12544  ;;  %p2434_p5 = scmp.lt.s32.totalorder %s327_s26, %s327_s26 }
  0x21   : > { %p2427_p0 = scmp.ne.s32.totalorder %s327_s26, %s2426_s25  ;;  %p2435_p6 = scmp.lt.s32.totalorder %s2426_s25, %s2426_s25 }
  0x23   : > { %p2429_p1 = pnand %p2427_p0, %p2742_p9  ;;  %p2436_p3 = por %p2435_p6, %p2434_p5 }
  0x25   : > { %p2430_p2 = pneg %p2429_p1 }
  0x27   : > { %p2437_p4 = pnand %p2436_p3, %p2430_p2 }
  0x29   : > { %2440 = shalt.err (!%p2437_p4)
}
  0x2a   : > { %s2620_s28 = smov 128   ;;  %s2621_s29 = smov 8  }
  0x2b   : > { %2162 = dma.hbm_to_vmem [thread:$0]  (!%p2730_p7), %s2937_s1, 12544, %s327_s26, [#allocation9], %s2620_s28, %s2620_s28, %s2621_s29  }
  0x2c   : > { %s2622_s13 = smov [#allocation11]   ;;  %s2623_s16 = smov [#allocation10]  }
  0x2d   : > { %s364_s15 = sshll.u32 %s2622_s13, 4  ;;  %s342_s21 = sshll.u32 %s2623_s16, 4  ;;  %s365_s15 = int_to_ptr.vmem [resolvable:$true] %s364_s15  ;;  %s343_s21 = int_to_ptr.vmem [resolvable:$true] %s342_s21 }
  0x2e   : > { %s2441_s25 = scalar_lea.hbm %s2943_s7, 1024 }
  0x2f   : > { %p2442_p3 = scmp.ne.s32.totalorder %s2943_s7, %s2441_s25  ;;  %p2448_p8 = scmp.lt.u32.totalorder %s2441_s25, %s2943_s7 }
  0x31   : > { %p2444_p4 = pnand %p2442_p3, %p2742_p9 }
  0x33   : > { %p2445_p6 = pneg %p2444_p4 }
  0x35   : > { %p2450_p10 = pnand %p2448_p8, %p2445_p6 }
  0x37   : > { %2453 = shalt.err (!%p2450_p10)
}
  0x38   : > { %s2454_s26 = scalar_lea.vmem %s365_s15, 1024  ;;  %p2462_p0 = scmp.lt.s32.totalorder %s365_s15, %s365_s15 }
  0x39   : > { %p2455_p11 = scmp.ne.s32.totalorder %s365_s15, %s2454_s26  ;;  %p2463_p1 = scmp.lt.s32.totalorder %s2454_s26, %s2454_s26 }
  0x3b   : > { %p2457_p12 = pnand %p2455_p11, %p2742_p9  ;;  %p2464_p2 = por %p2463_p1, %p2462_p0 }
  0x3d   : > { %p2458_p13 = pneg %p2457_p12 }
  0x3f   : > { %p2465_p5 = pnand %p2464_p2, %p2458_p13 }
  0x41   : > { %2468 = shalt.err (!%p2465_p5)
}
  0x42   : > { %s2624_s11 = smov 64   ;;  %s2625_s18 = smov 4  }
  0x43   : > { %2168 = dma.hbm_to_vmem [thread:$0]  (!%p2730_p7), %s2943_s7, 1024, %s365_s15, [#allocation12], %s2624_s11, %s2624_s11, %s2625_s18  }
  0x44   : > { %s2469_s28 = scalar_lea.hbm %s2939_s3, 2048 }
  0x45   : > { %p2470_p3 = scmp.ne.s32.totalorder %s2939_s3, %s2469_s28  ;;  %p2476_p8 = scmp.lt.u32.totalorder %s2469_s28, %s2939_s3 }
  0x47   : > { %p2472_p4 = pnand %p2470_p3, %p2742_p9 }
  0x49   : > { %p2473_p6 = pneg %p2472_p4 }
  0x4b   : > { %p2478_p10 = pnand %p2476_p8, %p2473_p6 }
  0x4d   : > { %2481 = shalt.err (!%p2478_p10)
}
  0x4e   : > { %s2482_s16 = scalar_lea.vmem %s343_s21, 2048  ;;  %p2490_p0 = scmp.lt.s32.totalorder %s343_s21, %s343_s21 }
  0x4f   : > { %p2483_p11 = scmp.ne.s32.totalorder %s343_s21, %s2482_s16  ;;  %p2491_p1 = scmp.lt.s32.totalorder %s2482_s16, %s2482_s16 }
  0x51   : > { %p2485_p12 = pnand %p2483_p11, %p2742_p9  ;;  %p2492_p2 = por %p2491_p1, %p2490_p0 }
  0x53   : > { %p2486_p13 = pneg %p2485_p12 }
  0x55   : > { %p2493_p5 = pnand %p2492_p2, %p2486_p13 }
  0x57   : > { %2496 = shalt.err (!%p2493_p5)
}
  0x58   : > { %2165 = dma.hbm_to_vmem [thread:$0]  (!%p2730_p7), %s2939_s3, 2048, %s343_s21, [#allocation9], %s2624_s11, %s2624_s11, %s2625_s18  }
  0x59   : > { %s2626_s26 = smov [#allocation13]   ;;  %s2497_s22 = scalar_lea.hbm %s2945_s9, 1024 }
  0x5a   : > { %s380_s8 = sshll.u32 %s2626_s26, 4  ;;  %p2498_p6 = scmp.ne.s32.totalorder %s2945_s9, %s2497_s22  ;;  %s381_s8 = int_to_ptr.vmem [resolvable:$true] %s380_s8 }
  0x5b   : > { %p2504_p11 = scmp.lt.u32.totalorder %s2497_s22, %s2945_s9 }
  0x5c   : > { %p2500_p8 = pnand %p2498_p6, %p2742_p9 }
  0x5e   : > { %p2501_p10 = pneg %p2500_p8 }
  0x60   : > { %p2506_p12 = pnand %p2504_p11, %p2501_p10 }
  0x62   : > { %2509 = shalt.err (!%p2506_p12)
}
  0x63   : > { %s2510_s21 = scalar_lea.vmem %s381_s8, 1024  ;;  %p2518_p2 = scmp.lt.s32.totalorder %s381_s8, %s381_s8 }
  0x64   : > { %p2511_p13 = scmp.ne.s32.totalorder %s381_s8, %s2510_s21  ;;  %p2519_p5 = scmp.lt.s32.totalorder %s2510_s21, %s2510_s21 }
  0x66   : > { %p2513_p0 = pnand %p2511_p13, %p2742_p9  ;;  %p2520_p4 = por %p2519_p5, %p2518_p2 }
  0x68   : > { %p2514_p1 = pneg %p2513_p0 }
  0x6a   : > { %p2521_p3 = pnand %p2520_p4, %p2514_p1 }
  0x6c   : > { %2524 = shalt.err (!%p2521_p3)
}
  0x6d   : > { %2171 = dma.hbm_to_vmem [thread:$0]  (!%p2730_p7), %s2945_s9, 1024, %s381_s8, [#allocation12], %s2624_s11, %s2624_s11, %s2625_s18  }
  0x6e   : > { %p2963_p6 = scmp.lt.s32.totalorder %s2617_s19, 2  ;;  %p2964_p8 = scmp.eq.s32.totalorder %s2617_s19, 0 }
  0x6f   : > { %s2627_s15 = smov [#allocation5]   ;;  %s2525_s10 = scalar_lea.hbm %s2936_s0, 896 }
  0x70   : > { %p2827_p9 = pnand %p2964_p8, %p2963_p6  ;;  %s411_s25 = sshll.u32 %s2627_s15, 4  ;;  %s412_s25 = int_to_ptr.vmem [resolvable:$true] %s411_s25 }
  0x71   : > { %p2526_p3 = scmp.ne.s32.totalorder %s2936_s0, %s2525_s10  ;;  %p2532_p11 = scmp.lt.u32.totalorder %s2525_s10, %s2936_s0 }
  0x72   : > { %p2527_p7 = pneg %p2827_p9 }
  0x74   : > { %p2528_p4 = pnand %p2527_p7, %p2526_p3 }
  0x76   : > { %p2529_p10 = pneg %p2528_p4 }
  0x78   : > { %p2534_p12 = pnand %p2532_p11, %p2529_p10 }
  0x7a   : > { %2537 = shalt.err (!%p2534_p12)
}
  0x7b   : > { %s2538_s8 = scalar_lea.vmem %s412_s25, 896  ;;  %s2545_s28 = scalar_lea.vmem %s412_s25, 1792 }
  0x7c   : > { %p2539_p13 = scmp.ne.s32.totalorder %s412_s25, %s2538_s8  ;;  %p2546_p2 = scmp.lt.s32.totalorder %s412_s25, %s412_s25 }
  0x7d   : > { %p2547_p5 = scmp.lt.s32.totalorder %s2545_s28, %s2538_s8 }
  0x7e   : > { %p2541_p0 = pnand %p2539_p13, %p2527_p7 }
  0x7f   : > { %p2548_p6 = por %p2547_p5, %p2546_p2 }
  0x80   : > { %p2542_p1 = pneg %p2541_p0 }
  0x82   : > { %p2549_p8 = pnand %p2548_p6, %p2542_p1 }
  0x84   : > { %2552 = shalt.err (!%p2549_p8)
}
  0x85   : > { %2175 = dma.hbm_to_vmem [thread:$0]  (!%p2827_p9), %s2936_s0, 896, %s412_s25, [#allocation6]  }
  0x86   : > { %p2966_p3 = scmp.ne.s32.totalorder %s2960_s24, 0 }
  0x87   : > { %p2967_p4 = scmp.ne.s32.totalorder (!%p2966_p3), %s2958_s23, 0 }
  0x88   : > { %420 = sbr.rel (%p2966_p3) target bundleno = 1234 (0x4d2), region = 64 }
  0x8f   : > { %2592 = dma.done.wait (%p2967_p4), [#allocation6], 896  }
  0x90   : > { %2594 = vsyncadd (%p2967_p4), [#allocation6], 4294966400 }
  0x91   : > { %2596 = dma.done.wait (%p2967_p4), [#allocation9], 14592  }
  0x92   : > { %2598 = vsyncadd (%p2967_p4), [#allocation9], 4294952704 }
  0x93   : > { %2600 = dma.done.wait (%p2967_p4), [#allocation12], 2048  }
  0x94   : > { %2602 = vsyncadd (%p2967_p4), [#allocation12], 4294965248  ;;  %p1903_p9 = scmp.ne.s32.totalorder %s2609_s17, 0 }
  0x95   : > { %v2232_v0 = vld [vmem:[#allocation8 + $0x104] ss:$8 sps:$4 sm:$0xff] (!%p1903_p9)   ;;  %v2234_v1 = vld [vmem:[#allocation8 + $0x100] ss:$8 sps:$4 sm:$0xff] (!%p1903_p9)   ;;  %v2235_v2 = vld [vmem:[#allocation8 + $0x114] ss:$8 sps:$4 sm:$0xff] (!%p1903_p9)  }
  0x96   : > { %488 = sbr.rel (%p1903_p9) target bundleno = 734 (0x2de), region = 88  ;;  %1154 = vmatprep.subr.bf16.mxu0 (!%p1903_p9), %v2232_v0  ;;  %v2237_v3 = vld [vmem:[#allocation8 + $0x110] ss:$8 sps:$4 sm:$0xff] (!%p1903_p9)   ;;  %v2238_v4 = vld [vmem:[#allocation8 + $0x124] ss:$8 sps:$4 sm:$0xff] (!%p1903_p9)   ;;  %vm1109_vm0 = vcmask (!%p1903_p9), 130048  }
  0x97   : > { %1155 = vmatpush1.bf16.msra.mxu0 (!%p1903_p9), %v2234_v1  ;;  %v2240_v5 = vld [vmem:[#allocation8 + $0x120] ss:$8 sps:$4 sm:$0xff] (!%p1903_p9)   ;;  %v2241_v6 = vld [vmem:[#allocation8 + $0x134] ss:$8 sps:$4 sm:$0xff] (!%p1903_p9)   ;;  %v2243_v7 = vld [vmem:[#allocation8 + $0x130] ss:$8 sps:$4 sm:$0xff] (!%p1903_p9)  }
  0x98   : > { %1156 = vmatprep.subr.bf16.mxu0 (!%p1903_p9), %v2235_v2  ;;  %v2244_v8 = vld [vmem:[#allocation8 + $0x144] ss:$8 sps:$4 sm:$0xff] (!%p1903_p9)   ;;  %v2246_v9 = vld [vmem:[#allocation8 + $0x140] ss:$8 sps:$4 sm:$0xff] (!%p1903_p9)   ;;  %v2247_v10 = vld [vmem:[#allocation8 + $0x154] ss:$8 sps:$4 sm:$0xff] (!%p1903_p9)  }
  0x99   : > { %v2249_v11 = vld [vmem:[#allocation8 + $0x150] ss:$8 sps:$4 sm:$0xff] (!%p1903_p9)   ;;  %v2274_v12 = vld [vmem:[#allocation8 + $0x4] ss:$8 sps:$4 sm:$0xff] (!%p1903_p9)   ;;  %v2276_v13 = vld [vmem:[#allocation8] ss:$8 sps:$4 sm:$0xff] (!%p1903_p9)  }
  0x9a   : > { %v2250_v14 = vld [vmem:[#allocation8 + $0x164] ss:$8 sps:$4 sm:$0xff] (!%p1903_p9)   ;;  %1113 = vmatprep.subr.bf16.mxu1 (!%p1903_p9), %v2274_v12  ;;  %v2280_v15 = vld [vmem:[#allocation8 + $0x14] ss:$8 sps:$4 sm:$0xff] (!%p1903_p9)   ;;  %v2282_v16 = vld [vmem:[#allocation8 + $0x10] ss:$8 sps:$4 sm:$0xff] (!%p1903_p9)  }
  0x9b   : > { %1157 = vmatpush1.bf16.msra.mxu0 (!%p1903_p9), %v2237_v3  ;;  %1114 = vmatpush1.bf16.msra.mxu1 (!%p1903_p9), %v2276_v13  ;;  %v2252_v17 = vld [vmem:[#allocation8 + $0x160] ss:$8 sps:$4 sm:$0xff] (!%p1903_p9)   ;;  %v2253_v18 = vld [vmem:[#allocation8 + $0x174] ss:$8 sps:$4 sm:$0xff] (!%p1903_p9)   ;;  %v2286_v19 = vld [vmem:[#allocation8 + $0x24] ss:$8 sps:$4 sm:$0xff] (!%p1903_p9)  }
  0x9c   : > { %1158 = vmatprep.subr.bf16.mxu0 (!%p1903_p9), %v2238_v4  ;;  %1115 = vmatprep.subr.bf16.mxu1 (!%p1903_p9), %v2280_v15  ;;  %v498_v20 = vld [vmem:[#allocation5 + $0x18] sm:$0xff] (!%p1903_p9)  ;;  %v2255_v23 = vld [vmem:[#allocation8 + $0x170] ss:$8 sps:$4 sm:$0xff] (!%p1903_p9)   ;;  %v2292_v25 = vld [vmem:[#allocation8 + $0x34] ss:$8 sps:$4 sm:$0xff] (!%p1903_p9)  }
  0x9d   : > { %v2288_v21 = vld [vmem:[#allocation8 + $0x20] ss:$8 sps:$4 sm:$0xff]   ;;  %v505_v22 = vpack.c.bf16 %v498_v20, %v498_v20  ;;  %v2256_v24 = vld [vmem:[#allocation8 + $0x184] ss:$8 sps:$4 sm:$0xff]   ;;  %v2294_v27 = vld [vmem:[#allocation8 + $0x30] ss:$8 sps:$4 sm:$0xff]  }
  0x9e   : > { %v2258_v26 = vld [vmem:[#allocation8 + $0x180] ss:$8 sps:$4 sm:$0xff]   ;;  %v2298_v28 = vld [vmem:[#allocation8 + $0x44] ss:$8 sps:$4 sm:$0xff]   ;;  %v2259_v29 = vld [vmem:[#allocation8 + $0x194] ss:$8 sps:$4 sm:$0xff]  }
  0x9f   : > { %1159 = vmatpush1.bf16.msra.mxu0 %v2240_v5  ;;  %1116 = vmatpush1.bf16.msra.mxu1 %v2282_v16  ;;  %v2261_v30 = vld [vmem:[#allocation8 + $0x190] ss:$8 sps:$4 sm:$0xff]   ;;  %v2300_v31 = vld [vmem:[#allocation8 + $0x40] ss:$8 sps:$4 sm:$0xff]   ;;  %v2304_v32 = vld [vmem:[#allocation8 + $0x54] ss:$8 sps:$4 sm:$0xff]  }
  0xa0   : > { %1160 = vmatprep.subr.bf16.mxu0 %v2241_v6  ;;  %1117 = vmatprep.subr.bf16.mxu1 %v2286_v19  ;;  %v2262_v33 = vld [vmem:[#allocation8 + $0x1a4] ss:$8 sps:$4 sm:$0xff]   ;;  %v2264_v34 = vld [vmem:[#allocation8 + $0x1a0] ss:$8 sps:$4 sm:$0xff]   ;;  %v2306_v35 = vld [vmem:[#allocation8 + $0x50] ss:$8 sps:$4 sm:$0xff]  }
  0xa1   : > { %1186 = vmatprep.mubr.bf16.mxu0 %v505_v22  ;;  %v2310_v36 = vld [vmem:[#allocation8 + $0x64] ss:$8 sps:$4 sm:$0xff]   ;;  %v2265_v37 = vld [vmem:[#allocation8 + $0x1b4] ss:$8 sps:$4 sm:$0xff]   ;;  %v2267_v38 = vld [vmem:[#allocation8 + $0x1b0] ss:$8 sps:$4 sm:$0xff]  }
  0xa2   : > { %v2312_v39 = vld [vmem:[#allocation8 + $0x60] ss:$8 sps:$4 sm:$0xff]   ;;  %v2316_v40 = vld [vmem:[#allocation8 + $0x74] ss:$8 sps:$4 sm:$0xff]   ;;  %v2268_v41 = vld [vmem:[#allocation8 + $0x1c4] ss:$8 sps:$4 sm:$0xff]  }
  0xa3   : > { %1161 = vmatpush1.bf16.msra.mxu0 %v2243_v7  ;;  %1118 = vmatpush1.bf16.msra.mxu1 %v2288_v21  ;;  %v2270_v42 = vld [vmem:[#allocation8 + $0x1c0] ss:$8 sps:$4 sm:$0xff]   ;;  %v2318_v43 = vld [vmem:[#allocation8 + $0x70] ss:$8 sps:$4 sm:$0xff]   ;;  %v2322_v44 = vld [vmem:[#allocation8 + $0x84] ss:$8 sps:$4 sm:$0xff]  }
  0xa4   : > { %1162 = vmatprep.subr.bf16.mxu0 %v2244_v8  ;;  %1119 = vmatprep.subr.bf16.mxu1 %v2292_v25  ;;  %v2271_v45 = vld [vmem:[#allocation8 + $0x1d4] ss:$8 sps:$4 sm:$0xff]   ;;  %v2273_v46 = vld [vmem:[#allocation8 + $0x1d0] ss:$8 sps:$4 sm:$0xff]   ;;  %v2324_v47 = vld [vmem:[#allocation8 + $0x80] ss:$8 sps:$4 sm:$0xff]  }
  0xa5   : > { %v2328_v48 = vld [vmem:[#allocation8 + $0x94] ss:$8 sps:$4 sm:$0xff]   ;;  %v2277_v49 = vld [vmem:[#allocation8 + $0x1e4] ss:$8 sps:$4 sm:$0xff]   ;;  %v2279_v50 = vld [vmem:[#allocation8 + $0x1e0] ss:$8 sps:$4 sm:$0xff]  }
  0xa6   : > { %v2330_v51 = vld [vmem:[#allocation8 + $0x90] ss:$8 sps:$4 sm:$0xff]   ;;  %v2334_v52 = vld [vmem:[#allocation8 + $0xa4] ss:$8 sps:$4 sm:$0xff]   ;;  %v2283_v53 = vld [vmem:[#allocation8 + $0x1f4] ss:$8 sps:$4 sm:$0xff]  }
  0xa7   : > { %1163 = vmatpush1.bf16.msra.mxu0 %v2246_v9  ;;  %1120 = vmatpush1.bf16.msra.mxu1 %v2294_v27  ;;  %v2285_v54 = vld [vmem:[#allocation8 + $0x1f0] ss:$8 sps:$4 sm:$0xff]   ;;  %v497_v55 = vld [vmem:[#allocation5 + $0x10] sm:$0xff]  ;;  %v2340_v57 = vld [vmem:[#allocation8 + $0xb4] ss:$8 sps:$4 sm:$0xff]  }
  0xa8   : > { %1164 = vmatprep.subr.bf16.mxu0 %v2247_v10  ;;  %1121 = vmatprep.subr.bf16.mxu1 %v2298_v28  ;;  %v2336_v56 = vld [vmem:[#allocation8 + $0xa0] ss:$8 sps:$4 sm:$0xff]   ;;  %v2291_v58 = vld [vmem:[#allocation8 + $0x204] ss:$8 sps:$4 sm:$0xff]   ;;  %v504_v59 = vpack.c.bf16 %v497_v55, %v497_v55  ;;  %v2342_v60 = vld [vmem:[#allocation8 + $0xb0] ss:$8 sps:$4 sm:$0xff]  }
  0xa9   : > { %v496_v61 = vld [vmem:[#allocation5 + $0x8] sm:$0xff]  ;;  %v2289_v62 = vld [vmem:[#allocation8 + $0x200] ss:$8 sps:$4 sm:$0xff]   ;;  %v2346_v63 = vld [vmem:[#allocation8 + $0xc4] ss:$8 sps:$4 sm:$0xff]  }
  0xaa   : > { %v503_v0 = vpack.c.bf16 %v496_v61, %v496_v61  ;;  %v2297_v1 = vld [vmem:[#allocation8 + $0x214] ss:$8 sps:$4 sm:$0xff]   ;;  %v2348_v2 = vld [vmem:[#allocation8 + $0xc0] ss:$8 sps:$4 sm:$0xff]   ;;  %v2295_v4 = vld [vmem:[#allocation8 + $0x210] ss:$8 sps:$4 sm:$0xff]  }
  0xab   : > { %1165 = vmatpush1.bf16.msra.mxu0 %v2249_v11  ;;  %1122 = vmatpush1.bf16.msra.mxu1 %v2300_v31  ;;  %v500_v3 = vld [vmem:[#allocation5 + $0x28] sm:$0xff]  ;;  %v2303_v7 = vld [vmem:[#allocation8 + $0x224] ss:$8 sps:$4 sm:$0xff]   ;;  %v2301_v8 = vld [vmem:[#allocation8 + $0x220] ss:$8 sps:$4 sm:$0xff]  }
  0xac   : > { %1166 = vmatprep.subr.bf16.mxu0 %v2250_v14  ;;  %1123 = vmatprep.subr.bf16.mxu1 %v2304_v32  ;;  %v2352_v5 = vld [vmem:[#allocation8 + $0xd4] ss:$8 sps:$4 sm:$0xff]   ;;  %v507_v6 = vpack.c.bf16 %v500_v3, %v500_v3  ;;  %v2354_v9 = vld [vmem:[#allocation8 + $0xd0] ss:$8 sps:$4 sm:$0xff]   ;;  %v2358_v10 = vld [vmem:[#allocation8 + $0xe4] ss:$8 sps:$4 sm:$0xff]  }
  0xad   : > { %1145 = vmatprep.mubr.bf16.mxu1 %v503_v0  ;;  %v2309_v11 = vld [vmem:[#allocation8 + $0x234] ss:$8 sps:$4 sm:$0xff]   ;;  %v2307_v12 = vld [vmem:[#allocation8 + $0x230] ss:$8 sps:$4 sm:$0xff]   ;;  %v2360_v13 = vld [vmem:[#allocation8 + $0xe0] ss:$8 sps:$4 sm:$0xff]  }
  0xae   : > { %v2364_v14 = vld [vmem:[#allocation8 + $0xf4] ss:$8 sps:$4 sm:$0xff]   ;;  %v2315_v15 = vld [vmem:[#allocation8 + $0x244] ss:$8 sps:$4 sm:$0xff]   ;;  %v2366_v16 = vld [vmem:[#allocation8 + $0xf0] ss:$8 sps:$4 sm:$0xff]  }
  0xaf   : > { %1167 = vmatpush1.bf16.msra.mxu0 %v2252_v17  ;;  %1124 = vmatpush1.bf16.msra.mxu1 %v2306_v35  ;;  %v495_v17 = vld [vmem:[#allocation5] sm:$0xff]  ;;  %v2375_v19 = vld [vmem:[#allocation8 + $0x304] ss:$8 sps:$4 sm:$0xff]   ;;  %v2373_v22 = vld [vmem:[#allocation8 + $0x300] ss:$8 sps:$4 sm:$0xff]  }
  0xb0   : > { %1168 = vmatprep.subr.bf16.mxu0 %v2253_v18  ;;  %1125 = vmatprep.subr.bf16.mxu1 %v2310_v36  ;;  %v2313_v18 = vld [vmem:[#allocation8 + $0x240] ss:$8 sps:$4 sm:$0xff]   ;;  %v2321_v20 = vld [vmem:[#allocation8 + $0x254] ss:$8 sps:$4 sm:$0xff]   ;;  %v502_v21 = vpack.c.bf16 %v495_v17, %v495_v17  ;;  %v2327_v25 = vld [vmem:[#allocation8 + $0x264] ss:$8 sps:$4 sm:$0xff]  }
  0xb1   : > { %v501_v27 = vld [vmem:[#allocation5 + $0x30] sm:$0xff]  ;;  %v2380_v31 = vld [vmem:[#allocation10] sm:$0xff]   ;;  %v2382_v35 = vld [vmem:[#allocation10 + $0x8] sm:$0xff]  }
  0xb2   : > { %v2325_v28 = vld [vmem:[#allocation8 + $0x260] ss:$8 sps:$4 sm:$0xff]   ;;  %v2331_v32 = vld [vmem:[#allocation8 + $0x270] ss:$8 sps:$4 sm:$0xff]  }
  0xb3   : > { %1169 = vmatpush1.bf16.msra.mxu0 %v2255_v23  ;;  %1126 = vmatpush1.bf16.msra.mxu1 %v2312_v39  ;;  %v2319_v23 = vld [vmem:[#allocation8 + $0x250] ss:$8 sps:$4 sm:$0xff]   ;;  %v2337_v36 = vld [vmem:[#allocation8 + $0x280] ss:$8 sps:$4 sm:$0xff]  }
  0xb4   : > { %1170 = vmatprep.subr.bf16.mxu0 %v2256_v24  ;;  %1127 = vmatprep.subr.bf16.mxu1 %v2316_v40  ;;  %v2379_v24 = vld [vmem:[#allocation10 + $0x40] sm:$0xff]   ;;  %v2384_v39 = vld [vmem:[#allocation10 + $0x10] sm:$0xff]   ;;  %v2385_v55 = vld [vmem:[#allocation10 + $0x58] sm:$0xff]  }
  0xb5   : > { %v2343_v40 = vld [vmem:[#allocation8 + $0x290] ss:$8 sps:$4 sm:$0xff]   ;;  %v2391_v61 = vld [vmem:[#allocation10 + $0x70] sm:$0xff]   ;;  %v2394_v0 = vld [vmem:[#allocation10 + $0x38] sm:$0xff]  }
  0xb7   : > { %1171 = vmatpush1.bf16.msra.mxu0 %v2258_v26  ;;  %1128 = vmatpush1.bf16.msra.mxu1 %v2318_v43  ;;  %v2628_v26 = vmov 0   ;;  %v2357_v43 = vld [vmem:[#allocation8 + $0x2b4] ss:$8 sps:$4 sm:$0xff]  }
  0xb8   : > { %1172 = vmatprep.subr.bf16.mxu0 %v2259_v29  ;;  %1129 = vmatprep.subr.bf16.mxu1 %v2322_v44  ;;  %v2333_v29 = vld [vmem:[#allocation8 + $0x274] ss:$8 sps:$4 sm:$0xff]   ;;  %v2355_v44 = vld [vmem:[#allocation8 + $0x2b0] ss:$8 sps:$4 sm:$0xff]  }
  0xbb   : > { %1173 = vmatpush1.bf16.msra.mxu0 %v2261_v30  ;;  %1130 = vmatpush1.bf16.msra.mxu1 %v2324_v47  ;;  %v508_v30 = vpack.c.bf16 %v501_v27, %v501_v27  ;;  %v2369_v47 = vld [vmem:[#allocation8 + $0x2d4] ss:$8 sps:$4 sm:$0xff]  }
  0xbc   : > { %1174 = vmatprep.subr.bf16.mxu0 %v2262_v33  ;;  %1131 = vmatprep.subr.bf16.mxu1 %v2328_v48  ;;  %v2381_v33 = vld [vmem:[#allocation10 + $0x48] sm:$0xff]  }
  0xbd   : > { %v2367_v48 = vld [vmem:[#allocation8 + $0x2d0] ss:$8 sps:$4 sm:$0xff]  }
  0xbf   : > { %1175 = vmatpush1.bf16.msra.mxu0 %v2264_v34  ;;  %1132 = vmatpush1.bf16.msra.mxu1 %v2330_v51  ;;  %v2339_v34 = vld [vmem:[#allocation8 + $0x284] ss:$8 sps:$4 sm:$0xff]   ;;  %v2378_v51 = vld [vmem:[#allocation8 + $0x2f4] ss:$8 sps:$4 sm:$0xff]  }
  0xc0   : > { %1176 = vmatprep.subr.bf16.mxu0 %v2265_v37  ;;  %1133 = vmatprep.subr.bf16.mxu1 %v2334_v52  ;;  %v2383_v37 = vld [vmem:[#allocation10 + $0x50] sm:$0xff]   ;;  %v2376_v52 = vld [vmem:[#allocation8 + $0x2f0] ss:$8 sps:$4 sm:$0xff]  }
  0xc3   : > { %1177 = vmatpush1.bf16.msra.mxu0 %v2267_v38  ;;  %1134 = vmatpush1.bf16.msra.mxu1 %v2336_v56  ;;  %v2345_v38 = vld [vmem:[#allocation8 + $0x294] ss:$8 sps:$4 sm:$0xff]   ;;  %v2386_v56 = vld [vmem:[#allocation10 + $0x18] sm:$0xff]  }
  0xc4   : > { %1178 = vmatprep.subr.bf16.mxu0 %v2268_v41  ;;  %1135 = vmatprep.subr.bf16.mxu1 %v2340_v57  ;;  %v2351_v41 = vld [vmem:[#allocation8 + $0x2a4] ss:$8 sps:$4 sm:$0xff]   ;;  %v2387_v57 = vld [vmem:[#allocation10 + $0x60] sm:$0xff]  }
  0xc7   : > { %1179 = vmatpush1.bf16.msra.mxu0 %v2270_v42  ;;  %1136 = vmatpush1.bf16.msra.mxu1 %v2342_v60  ;;  %v2349_v42 = vld [vmem:[#allocation8 + $0x2a0] ss:$8 sps:$4 sm:$0xff]   ;;  %v2390_v60 = vld [vmem:[#allocation10 + $0x28] sm:$0xff]  }
  0xc8   : > { %1180 = vmatprep.subr.bf16.mxu0 %v2271_v45  ;;  %1137 = vmatprep.subr.bf16.mxu1 %v2346_v63  ;;  %v2363_v45 = vld [vmem:[#allocation8 + $0x2c4] ss:$8 sps:$4 sm:$0xff]  }
  0xc9   : > { %v2393_v63 = vld [vmem:[#allocation10 + $0x78] sm:$0xff]  }
  0xcb   : > { %1181 = vmatpush1.bf16.msra.mxu0 %v2273_v46  ;;  %1138 = vmatpush1.bf16.msra.mxu1 %v2348_v2  ;;  %v2361_v46 = vld [vmem:[#allocation8 + $0x2c0] ss:$8 sps:$4 sm:$0xff]  }
  0xcc   : > { %1182 = vmatprep.subr.bf16.mxu0 %v2277_v49  ;;  %1139 = vmatprep.subr.bf16.mxu1 %v2352_v5  ;;  %v2372_v49 = vld [vmem:[#allocation8 + $0x2e4] ss:$8 sps:$4 sm:$0xff]  }
  0xcf   : > { %1183 = vmatpush1.bf16.msra.mxu0 %v2279_v50  ;;  %1140 = vmatpush1.bf16.msra.mxu1 %v2354_v9  ;;  %v2370_v50 = vld [vmem:[#allocation8 + $0x2e0] ss:$8 sps:$4 sm:$0xff]   ;;  %v609_v9 = vlaneseq }
  0xd0   : > { %1184 = vmatprep.subr.bf16.mxu0 %v2283_v53  ;;  %1141 = vmatprep.subr.bf16.mxu1 %v2358_v10  ;;  %v499_v53 = vld [vmem:[#allocation5 + $0x20] sm:$0xff] }
  0xd1   : > { %v610_v10 = vshrl.u32 %v609_v9, 7 }
  0xd3   : > { %1185 = vmatpush1.bf16.msra.mxu0 %v2285_v54  ;;  %1142 = vmatpush1.bf16.msra.mxu1 %v2360_v13  ;;  %v506_v54 = vpack.c.bf16 %v499_v53, %v499_v53  ;;  %v615_v13 = vsub.s32 1, %v610_v10 }
  0xd4   : > { %1195 = vmatprep.subr.bf16.mxu0 %v2291_v58  ;;  %1143 = vmatprep.subr.bf16.mxu1 %v2364_v14  ;;  %v2388_v58 = vld [vmem:[#allocation10 + $0x20] sm:$0xff]  }
  0xd6   : > { %1187 = vmatmul.mubr.bf16.vlgmr.msra.gmra.mrb[0].mxu0 %v504_v59  ;;  %v2389_v59 = vld [vmem:[#allocation10 + $0x68] sm:$0xff]  }
  0xd7   : > { %1196 = vmatpush1.bf16.msra.mxu0 %v2289_v62  ;;  %1227 = vmatprep.mubr.bf16.mxu0 %v507_v6  ;;  %v2392_v62 = vld [vmem:[#allocation10 + $0x30] sm:$0xff]  }
  0xd8   : > { %1197 = vmatprep.subr.bf16.mxu0 %v2297_v1  ;;  %1144 = vmatpush1.bf16.msra.mxu1 %v2366_v16 }
  0xd9   : > { %1236 = vmatprep.subr.bf16.mxu1 %v2375_v19 }
  0xdb   : > { %1198 = vmatpush1.bf16.msra.mxu0 %v2295_v4  ;;  %1146 = vmatmul.mubr.bf16.vlgmr.msra.gmra.mrb[0].mxu1 %v502_v21 }
  0xdc   : > { %1199 = vmatprep.subr.bf16.mxu0 %v2303_v7  ;;  %1237 = vmatpush1.bf16.msra.mxu1 %v2373_v22 }
  0xdd   : > { %1268 = vmatprep.mubr.bf16.mxu1 %v2628_v26  ;;  %2045 = vmatprep.subr.bf16.mxu1 %v2379_v24 }
  0xdf   : > { %1200 = vmatpush1.bf16.msra.mxu0 %v2301_v8 }
  0xe0   : > { %1201 = vmatprep.subr.bf16.mxu0 %v2309_v11  ;;  %v611_v11 = vsub.s32 0, %v610_v10 }
  0xe3   : > { %1202 = vmatpush1.bf16.msra.mxu0 %v2307_v12  ;;  %2002 = vmatmul.mubr.msk.bf16.vlgmr.msra.gmra.mrb[4].mxu1 %vm1109_vm0, %v508_v30  ;;  %v607_v12 = vld [vmem:[%s2938_s2] sm:$0x3]  ;;  %v2629_v30 = vmov 0.0  }
  0xe4   : > { %1203 = vmatprep.subr.bf16.mxu0 %v2315_v15  ;;  %2046 = vmatpush3.bf16.msra.mxu1 %v2380_v31  ;;  %v612_v14 = vrot.slane %v607_v12, %v611_v11  ;;  %v616_v15 = vrot.slane %v607_v12, %v615_v13  ;;  %493 = vst [vmem:[#allocation3] sm:$0x1] %v2629_v30  ;;  %494 = vst [vmem:[#allocation4] sm:$0x1] %v2629_v30 }
  0xe5   : > { %2047 = vmatprep.subr.bf16.mxu1 %v2381_v33 }
  0xe7   : > { %1204 = vmatpush1.bf16.msra.mxu0 %v2313_v18 }
  0xe8   : > { %1205 = vmatprep.subr.bf16.mxu0 %v2321_v20  ;;  %2048 = vmatpush3.bf16.msra.mxu1 %v2382_v35 }
  0xe9   : > { %2049 = vmatprep.subr.bf16.mxu1 %v2383_v37 }
  0xeb   : > { %1206 = vmatpush1.bf16.msra.mxu0 %v2319_v23 }
  0xec   : > { %1207 = vmatprep.subr.bf16.mxu0 %v2327_v25  ;;  %2050 = vmatpush3.bf16.msra.mxu1 %v2384_v39 }
  0xed   : > { %2051 = vmatprep.subr.bf16.mxu1 %v2385_v55 }
  0xef   : > { %1208 = vmatpush1.bf16.msra.mxu0 %v2325_v28 }
  0xf0   : > { %1209 = vmatprep.subr.bf16.mxu0 %v2333_v29  ;;  %2052 = vmatpush3.bf16.msra.mxu1 %v2386_v56 }
  0xf1   : > { %2053 = vmatprep.subr.bf16.mxu1 %v2387_v57 }
  0xf3   : > { %1210 = vmatpush1.bf16.msra.mxu0 %v2331_v32  ;;  %v2003_v32 = vld [vmem:[%s2940_s4] ss:$0 sm:$0xff] }
  0xf4   : > { %1211 = vmatprep.subr.bf16.mxu0 %v2339_v34  ;;  %2054 = vmatpush3.bf16.msra.mxu1 %v2388_v58 }
  0xf5   : > { %2055 = vmatprep.subr.bf16.mxu1 %v2389_v59 }
  0xf7   : > { %1212 = vmatpush1.bf16.msra.mxu0 %v2337_v36 }
  0xf8   : > { %1213 = vmatprep.subr.bf16.mxu0 %v2345_v38  ;;  %2056 = vmatpush3.bf16.msra.mxu1 %v2390_v60 }
  0xf9   : > { %2057 = vmatprep.subr.bf16.mxu1 %v2391_v61 }
  0xfb   : > { %1214 = vmatpush1.bf16.msra.mxu0 %v2343_v40 }
  0xfc   : > { %1215 = vmatprep.subr.bf16.mxu0 %v2351_v41  ;;  %2058 = vmatpush3.bf16.msra.mxu1 %v2392_v62 }
  0xfd   : > { %2059 = vmatprep.subr.bf16.mxu1 %v2393_v63 }
  0xff   : > { %1216 = vmatpush1.bf16.msra.mxu0 %v2349_v42 }
 0x100   : > { %1217 = vmatprep.subr.bf16.mxu0 %v2357_v43  ;;  %2060 = vmatpush3.bf16.msra.mxu1 %v2394_v0 }
 0x103   : > { %1218 = vmatpush1.bf16.msra.mxu0 %v2355_v44 }
 0x104   : > { %1219 = vmatprep.subr.bf16.mxu0 %v2363_v45 }
 0x107   : > { %1220 = vmatpush1.bf16.msra.mxu0 %v2361_v46 }
 0x108   : > { %1221 = vmatprep.subr.bf16.mxu0 %v2369_v47 }
 0x10b   : > { %1222 = vmatpush1.bf16.msra.mxu0 %v2367_v48 }
 0x10c   : > { %1223 = vmatprep.subr.bf16.mxu0 %v2372_v49  ;;  %v1456_v49 = vld [vmem:[#allocation3] sm:$0x1] }
 0x10f   : > { %1224 = vmatpush1.bf16.msra.mxu0 %v2370_v50 }
 0x110   : > { %1225 = vmatprep.subr.bf16.mxu0 %v2378_v51 }
 0x113   : > { %1226 = vmatpush1.bf16.msra.mxu0 %v2376_v52  ;;  %v1465_v52 = vld [vmem:[#allocation4] sm:$0x1] }
 0x116   : > { %1228 = vmatmul.mubr.bf16.vlgmr.msra.gmra.mrb[0].mxu0 %v506_v54 }
 0x1ae   : > { %v1147_v1 = vpop.f32.mrb[0].mxu1 }
 0x1af   : > { %v1149_v2 = vpop.f32.mrb[1].mxu1  ;;  %v1148_v16 = vadd.f32 %v1147_v1, %v612_v14 }
 0x1b0   : > { %v1151_v3 = vpop.f32.mrb[2].mxu1  ;;  %v1150_v17 = vadd.f32 %v1149_v2, %v616_v15 }
 0x1b1   : > { %v1152_v4 = vpop.f32.mrb[3].mxu1 }
 0x1b6   : > { %v1270_v5 = vpop.f32.mrb[4].mxu1 }
 0x1b7   : > { %v1272_v6 = vpop.f32.mrb[5].mxu1 }
 0x1b8   : > { %v1274_v7 = vpop.f32.mrb[6].mxu1 }
 0x1b9   : > { %v1275_v8 = vpop.f32.mrb[7].mxu1 }
 0x1e9   : > { %v1229_v18 = vpop.f32.mrb[0].mxu0 }
 0x1ea   : > { %v2126_v19 = vadd.f32 %v1229_v18, %v1148_v16  ;;  %v1231_v20 = vpop.f32.mrb[1].mxu0 }
 0x1eb   : > { %v2129_v21 = vadd.f32 %v1231_v20, %v1150_v17  ;;  %v1233_v22 = vpop.f32.mrb[2].mxu0 }
 0x1ec   : > { %v2127_v23 = vadd.f32 %v2126_v19, %v1270_v5  ;;  %v1234_v24 = vpop.f32.mrb[3].mxu0 }
 0x1ed   : > { %v2130_v25 = vadd.f32 %v2129_v21, %v1272_v6 }
 0x1ee   : > { %v1277_v26 = vmax.f32 %v2127_v23, 0.0 }
 0x1ef   : > { %v1278_v27 = vmax.f32 %v2130_v25, 0.0 }
 0x1f0   : > { %v1279_v29 = vpack.c.bf16 %v1277_v26, %v1277_v26 }
 0x1f1   : > { %v1280_v28 = vpack.c.bf16 %v1278_v27, %v1278_v27 }
 0x1f3   : > { %1448 = vmatprep.mubr.bf16.mxu1 %v1280_v28 }
 0x1f4   : > { %1449 = vmatmul.mubr.bf16.vlgmr.msra.gmra.mrb[8].mxu1 %v1279_v29 }
 0x2c7   : > { %v2061_v31 = vpop.f32.mrb[8].mxu1 }
 0x2c8   : > { %v2062_v33 = vpop.f32.mrb[9].mxu1 }
 0x2c9   : > { %v2063_v34 = vadd.f32 %v2062_v33, %v2061_v31  ;;  %v2064_v35 = vpop.f32.mrb[10].mxu1 }
 0x2ca   : > { %v2065_v36 = vpop.f32.mrb[11].mxu1 }
 0x2cb   : > { %v1451_v37 = vadd.f32 %v2063_v34, %v2003_v32 }
 0x2cd   : > { %v1457_v38 = vrot.slane %v1451_v37, 4  ;;  %v1466_v39 = vmul.f32 %v1451_v37, %v1451_v37  ;;  %v1475_v40 = vpack.c.bf16 %v1451_v37, %v1451_v37 }
 0x2cf   : > { %v1458_v41 = vadd.f32 %v1457_v38, %v1451_v37  ;;  %v1467_v42 = vrot.slane %v1466_v39, 4  ;;  %1478 = vst [vmem:[#allocation2] sm:$0xf] %v1475_v40 }
 0x2d1   : > { %v1459_v43 = vrot.slane %v1458_v41, 2  ;;  %v1468_v44 = vadd.f32 %v1467_v42, %v1466_v39 }
 0x2d3   : > { %v1460_v45 = vadd.f32 %v1459_v43, %v1458_v41  ;;  %v1469_v46 = vrot.slane %v1468_v44, 2 }
 0x2d5   : > { %v1461_v47 = vrot.slane %v1460_v45, 1  ;;  %v1470_v48 = vadd.f32 %v1469_v46, %v1468_v44 }
 0x2d7   : > { %v1462_v50 = vadd.f32 %v1461_v47, %v1460_v45  ;;  %v1471_v51 = vrot.slane %v1470_v48, 1 }
 0x2d9   : > { %v1463_v53 = vadd.f32 %v1462_v50, %v1456_v49  ;;  %v1472_v54 = vadd.f32 %v1471_v51, %v1470_v48 }
 0x2db   : > { %1464 = vst [vmem:[#allocation3] sm:$0x1] %v1463_v53  ;;  %v1473_v55 = vadd.f32 %v1472_v54, %v1465_v52 }
 0x2dd   : > { %1474 = vst [vmem:[#allocation4] sm:$0x1] %v1473_v55 }
 0x2de PF: > { %p2020_p7 = scmp.ne.s32.totalorder %s2609_s17, 1 }
 0x2df   : > { %v2395_v56 = vld [vmem:[#allocation11] sm:$0xff] (!%p2020_p7)   ;;  %v2630_v57 = vmov (!%p2020_p7), 0.0   ;;  %v2396_v58 = vld [vmem:[#allocation11 + $0x8] sm:$0xff] (!%p2020_p7)   ;;  %vm2631_vm1 = vmmov (!%p2020_p7), 0   ;;  %v2397_v59 = vld [vmem:[#allocation11 + $0x10] sm:$0xff] (!%p2020_p7)   ;;  %v1495_v3 = vlaneseq (!%p2020_p7)  ;;  %s2968_s27 = sld [smem:[#allocation21_spill]] (!%p2020_p7) }
 0x2e0   : > { %1482 = sbr.rel (%p2020_p7) target bundleno = 1205 (0x4b5), region = 96  ;;  %2085 = vmatprep.subr.bf16.mxu0 (!%p2020_p7), %v2630_v57  ;;  %2105 = vmatprep.subr.bf16.mxu1 (!%p2020_p7), %v2630_v57  ;;  %v2398_v62 = vld [vmem:[#allocation11 + $0x18] sm:$0xff] (!%p2020_p7)   ;;  %v2403_v1 = vld [vmem:[#allocation13] sm:$0xff] (!%p2020_p7)   ;;  %v2404_v4 = vld [vmem:[#allocation13 + $0x8] sm:$0xff] (!%p2020_p7)   ;;  %s2969_s20 = sld [smem:[#allocation22_spill]] (!%p2020_p7) }
 0x2e1   : > { %2086 = vmatpush3.bf16.msra.mxu0 (!%p2020_p7), %v2395_v56  ;;  %2101 = vmatprep.mubr.msk.bf16.mxu0 (!%p2020_p7), %vm2631_vm1, %v2630_v57  ;;  %v2399_v6 = vld [vmem:[#allocation11 + $0x20] sm:$0xff] (!%p2020_p7)   ;;  %v1496_v8 = vshrl.u32 (!%p2020_p7), %v1495_v3, 7  ;;  %v2405_v9 = vld [vmem:[#allocation13 + $0x10] sm:$0xff] (!%p2020_p7)   ;;  %v2400_v11 = vld [vmem:[#allocation11 + $0x28] sm:$0xff] (!%p2020_p7)  }
 0x2e2   : > { %2087 = vmatprep.subr.bf16.mxu0 (!%p2020_p7), %v2630_v57  ;;  %2121 = vmatprep.mubr.msk.bf16.mxu1 (!%p2020_p7), %vm2631_vm1, %v2630_v57  ;;  %v1483_v60 = vld [vmem:[#allocation3] sm:$0x1] (!%p2020_p7)  ;;  %v1492_v14 = vld [vmem:[#allocation2] sm:$0xf] (!%p2020_p7)  ;;  %v2401_v15 = vld [vmem:[#allocation11 + $0x30] sm:$0xff] (!%p2020_p7)  }
 0x2e3   : > { %v1484_v63 = vmul.f32 (!%p2020_p7), 0.125, %v1483_v60  ;;  %2106 = vmatpush3.bf16.msra.mxu1 (!%p2020_p7), %v2403_v1  ;;  %v1497_v12 = vsub.s32 (!%p2020_p7), 0, %v1496_v8  ;;  %v2406_v13 = vld [vmem:[#allocation13 + $0x18] sm:$0xff] (!%p2020_p7)   ;;  %v1493_v16 = vunpack.c.l.bf16 (!%p2020_p7), %v1492_v14  ;;  %v2407_v18 = vld [vmem:[#allocation13 + $0x20] sm:$0xff] (!%p2020_p7)   ;;  %v2408_v21 = vld [vmem:[#allocation13 + $0x28] sm:$0xff] (!%p2020_p7)  }
 0x2e4   : > { %v1485_v61 = vld [vmem:[#allocation4] sm:$0x1] (!%p2020_p7)  ;;  %2107 = vmatprep.subr.bf16.mxu1 (!%p2020_p7), %v2630_v57  ;;  %v2021_v24 = vld [vmem:[%s2941_s5] ss:$0 sm:$0xff] (!%p2020_p7)  ;;  %v2409_v31 = vld [vmem:[#allocation13 + $0x30] sm:$0xff] (!%p2020_p7)  }
 0x2e5   : > { %2088 = vmatpush3.bf16.msra.mxu0 (!%p2020_p7), %v2396_v58  ;;  %v1486_v0 = vmul.f32 (!%p2020_p7), 0.125, %v1485_v61  ;;  %v1487_v2 = vmul.f32 (!%p2020_p7), %v1484_v63, %v1484_v63  ;;  %v1498_v17 = vrot.slane (!%p2020_p7), %v1484_v63, %v1497_v12  ;;  %v2402_v19 = vld [vmem:[#allocation11 + $0x38] sm:$0xff] (!%p2020_p7)  }
 0x2e6   : > { %2089 = vmatprep.subr.bf16.mxu0 (!%p2020_p7), %v2630_v57  ;;  %v2022_v26 = vld [vmem:[%s2942_s6] ss:$0 sm:$0xff] (!%p2020_p7) }
 0x2e7   : > { %v1488_v5 = vsub.f32 %v1486_v0, %v1487_v2  ;;  %2108 = vmatpush3.bf16.msra.mxu1 %v2404_v4  ;;  %v1500_v20 = vsub.f32 %v1493_v16, %v1498_v17  ;;  %v2410_v32 = vld [vmem:[#allocation13 + $0x38] sm:$0xff]  }
 0x2e8   : > { %2109 = vmatprep.subr.bf16.mxu1 %v2630_v57  ;;  %v2023_v33 = vld [vmem:[%s2968_s27] ss:$0 sm:$0xff] }
 0x2e9   : > { %2090 = vmatpush3.bf16.msra.mxu0 %v2397_v59  ;;  %v1489_v7 = vmax.f32 %v1488_v5, 0.0  ;;  %v2032_v41 = vld [vmem:[%s2969_s20] ss:$0 sm:$0xff] }
 0x2ea   : > { %2091 = vmatprep.subr.bf16.mxu0 %v2630_v57 }
 0x2eb   : > { %v1501_v10 = vadd.f32 1e-05, %v1489_v7  ;;  %2110 = vmatpush3.bf16.msra.mxu1 %v2405_v9 }
 0x2ec   : > { %2111 = vmatprep.subr.bf16.mxu1 %v2630_v57 }
 0x2ed   : > { %2092 = vmatpush3.bf16.msra.mxu0 %v2398_v62  ;;  %2411 = vrsqrt.f32 %v1501_v10 }
 0x2ee   : > { %2093 = vmatprep.subr.bf16.mxu0 %v2630_v57 }
 0x2ef   : > { %2112 = vmatpush3.bf16.msra.mxu1 %v2406_v13 }
 0x2f0   : > { %2113 = vmatprep.subr.bf16.mxu1 %v2630_v57 }
 0x2f1   : > { %2094 = vmatpush3.bf16.msra.mxu0 %v2399_v6 }
 0x2f2   : > { %2095 = vmatprep.subr.bf16.mxu0 %v2630_v57 }
 0x2f3   : > { %2114 = vmatpush3.bf16.msra.mxu1 %v2407_v18 }
 0x2f4   : > { %2115 = vmatprep.subr.bf16.mxu1 %v2630_v57 }
 0x2f5   : > { %2096 = vmatpush3.bf16.msra.mxu0 %v2400_v11 }
 0x2f6   : > { %2097 = vmatprep.subr.bf16.mxu0 %v2630_v57 }
 0x2f7   : > { %v2412_v22 = vpop.eup %2411  ;;  %2116 = vmatpush3.bf16.msra.mxu1 %v2408_v21 }
 0x2f8   : > { %v1507_v23 = vrot.slane %v2412_v22, %v1497_v12  ;;  %2117 = vmatprep.subr.bf16.mxu1 %v2630_v57 }
 0x2f9   : > { %2098 = vmatpush3.bf16.msra.mxu0 %v2401_v15 }
 0x2fa   : > { %2099 = vmatprep.subr.bf16.mxu0 %v2630_v57  ;;  %v1509_v25 = vmul.f32 %v1507_v23, %v1500_v20 }
 0x2fb   : > { %2118 = vmatpush3.bf16.msra.mxu1 %v2409_v31 }
 0x2fc   : > { %v1517_v27 = vmul.f32 %v2021_v24, %v1509_v25  ;;  %2119 = vmatprep.subr.bf16.mxu1 %v2630_v57 }
 0x2fd   : > { %2100 = vmatpush3.bf16.msra.mxu0 %v2402_v19 }
 0x2fe   : > { %v1525_v28 = vadd.f32 %v2022_v26, %v1517_v27 }
 0x2ff   : > { %2120 = vmatpush3.bf16.msra.mxu1 %v2410_v32 }
 0x300   : > { %v1526_v29 = vmax.f32 %v1525_v28, 0.0 }
 0x302   : > { %v1527_v30 = vpack.c.bf16 %v1526_v29, %v1526_v29 }
 0x304   : > { %2102 = vmatmul.mubr.bf16.vlgmr.msra.gmra.mrb[0].mxu0 %v1527_v30 }
 0x3d7   : > { %v1633_v34 = vpop.f32.mrb[0].mxu0 }
 0x3d8   : > { %v1634_v35 = vadd.f32 %v2023_v33, %v1633_v34  ;;  %v2103_v36 = vpop.f32.mrb[1].mxu0 }
 0x3d9   : > { %v1636_v37 = vpop.f32.mrb[2].mxu0 }
 0x3da   : > { %v1639_v38 = vmax.f32 %v1634_v35, 0.0  ;;  %v2104_v39 = vpop.f32.mrb[3].mxu0 }
 0x3dc   : > { %v1640_v40 = vpack.c.bf16 %v1639_v38, %v1639_v38 }
 0x3de   : > { %2122 = vmatmul.mubr.bf16.vlgmr.msra.gmra.mrb[0].mxu1 %v1640_v40 }
 0x4b1   : > { %v1746_v42 = vpop.f32.mrb[0].mxu1 }
 0x4b2   : > { %v1747_v43 = vadd.f32 %v2032_v41, %v1746_v42  ;;  %v2123_v44 = vpop.f32.mrb[1].mxu1 }
 0x4b3   : > { %v1749_v45 = vpop.f32.mrb[2].mxu1 }
 0x4b4   : > { %1752 = vst [vmem:[#allocation14] sm:$0xff] %v1747_v43  ;;  %v2124_v46 = vpop.f32.mrb[3].mxu1 }
 0x4b5 PF: > { %s2970_s22 = sadd.s32 4294967295, %s2617_s19   ;;  %s2632_s18 = smov [#allocation14]  }
 0x4b6   : > { %p2901_p10 = scmp.eq.s32.totalorder %s2970_s22, 1  ;;  %s1768_s8 = sshll.u32 %s2632_s18, 4  ;;  %s1769_s8 = int_to_ptr.vmem [resolvable:$true] %s1768_s8 }
 0x4b7   : > { %s2553_s28 = scalar_lea.vmem %s1769_s8, 128  ;;  %s2559_s29 = scalar_lea.vmem %s1769_s8, 256 }
 0x4b8   : > { %p2554_p11 = scmp.ne.s32.totalorder %s1769_s8, %s2553_s28  ;;  %p2560_p0 = scmp.lt.s32.totalorder %s1769_s8, %s1769_s8 }
 0x4b9   : > { %p2561_p1 = scmp.lt.s32.totalorder %s2559_s29, %s2553_s28 }
 0x4ba   : > { %p2555_p12 = pnand %p2554_p11, %p2901_p10 }
 0x4bb   : > { %p2562_p2 = por %p2561_p1, %p2560_p0 }
 0x4bc   : > { %p2556_p13 = pneg %p2555_p12 }
 0x4be   : > { %p2563_p5 = pnand %p2562_p2, %p2556_p13 }
 0x4c0   : > { %2566 = shalt.err (!%p2563_p5)
}
 0x4c1   : > { %s2972_s24 = sld [smem:[#allocation23_spill]] }
 0x4c7   : > { %s2567_s30 = scalar_lea.hbm %s2972_s24, 128 }
 0x4c8   : > { %p2568_p6 = scmp.ne.s32.totalorder %s2972_s24, %s2567_s30  ;;  %p2573_p4 = scmp.lt.u32.totalorder %s2567_s30, %s2972_s24 }
 0x4ca   : > { %p2569_p8 = pnand %p2568_p6, %p2901_p10 }
 0x4cc   : > { %p2570_p3 = pneg %p2569_p8 }
 0x4ce   : > { %p2575_p9 = pnand %p2573_p4, %p2570_p3 }
 0x4d0   : > { %2578 = shalt.err (!%p2575_p9)
}
 0x4d1   : > { %2156 = dma.vmem_to_hbm [thread:$0]  (%p2901_p10), %s1769_s8, 128, %s2972_s24, [#allocation7]  }
 0x4d2 PF: > { %s2973_s25 = sadd.s32 4294967294, %s2617_s19   ;;  %p2974_p11 = scmp.ge.s32.totalorder %s2617_s19, 2 }
 0x4d3   : > { %p2193_p7 = scmp.eq.s32.totalorder %s2973_s25, 1 }
 0x4d5   : > { %p2177_p12 = pnand %p2193_p7, %p2974_p11 }
 0x4d7   : > { %2604 = dma.done.wait (!%p2177_p12), [#allocation7], 128  }
 0x4d8   : > { %2606 = vsyncadd (!%p2177_p12), [#allocation7], 4294967168  ;;  %s29_s19 = sadd.s32 1, %s2617_s19   ;;  %s2975_s17 = sld [smem:[#allocation19_spill]] }
 0x4d9   : > { %p26_p13 = scmp.ge.s32.totalorder %s29_s19, 4   ;;  %s2976_s18 = sld [smem:[#allocation20_spill]] }
 0x4db   :  { %28 = sbr.rel (!%p26_p13) target bundleno = 11 (0xb), region = 139 }
 0x4e2   :  { %1786 = vsyncpa [#allocation6], 1 }
 0x4e3   :  { %1788 = vsyncpa [#allocation6 + $0x1], 1 }
 0x4e4   :  { %1789 = vsyncpa [#allocation9], 1 }
 0x4e5   :  { %1790 = vsyncpa [#allocation12], 1 }
 0x4e6   :  { %1791 = vsyncpa [#allocation7], 1 }
 0x4e7   :  { %1793 = vsyncpa [#allocation7 + $0x1], 1 }

</bundles_post_ra>
